<compile_context>
chip_gen: v5e
topology: v5e:2x2
jax: 0.10.0
libtpu: 0.0.40
codegen_flags: <defaults>
</compile_context>

<pallas_src>
import math

import numpy as np
import jax
import jax.numpy as jnp
from jax import lax
from jax.experimental import pallas as pl
from jax.experimental.pallas import tpu as pltpu

_LANE = 128


# ----------------------------------------------------------------------------- helpers ----
def _round_up(x, m):
    return ((x + m - 1) // m) * m


def _pad2(a, shape, dtype):
    """Zero-pad a 2-D array into `shape` and cast to `dtype`."""
    out = jnp.zeros(shape, dtype)
    return out.at[: a.shape[0], : a.shape[1]].set(a.astype(dtype))


def _is_v5():
    try:
        return "v5" in jax.devices()[0].device_kind.lower()
    except Exception:
        return False


def _vmem_limit_bytes():
    """Per-generation VMEM budget: ~3/4 of physical capacity, capped at 100 MiB."""
    cap = 64 * 1024 * 1024
    try:
        info = pltpu.get_tpu_info()
        cap = int(getattr(info, "vmem_capacity_bytes", cap))
    except Exception:
        pass
    return int(min((cap * 3) // 4, 100 * 1024 * 1024))


def normalization(mat):
    """D^{-1/2} (A + I) D^{-1/2}, exactly as the module's `normalization`."""
    n = mat.shape[0]
    mat = mat + jnp.eye(n, dtype=mat.dtype)
    degree = mat.sum(axis=1)
    d_inv_sqrt = degree ** -0.5
    return (d_inv_sqrt[:, None] * mat) * d_inv_sqrt[None, :]


def build_module_adjacency(n):
    """Reproduce TMA_GraphConvolution's in-forward adjacency construction (hoisted to init).

    The module ignores the adjacency passed to forward(); it sums all 36 motif slices of
    tor_M (zeros in the provided code) and symmetric-normalizes.  With tor_M == 0 the
    result is the identity matrix.
    """
    tor_m = jnp.zeros((36, n, n), dtype=jnp.float32)   # as in the source file
    moti_adjacency = jnp.sum(tor_m, axis=0)            # loop over sorted indices == full sum
    adjacency = jnp.zeros((n, n), dtype=jnp.float32) + moti_adjacency
    a_hat = normalization(adjacency)
    is_identity = bool(jnp.allclose(a_hat, jnp.eye(n, dtype=jnp.float32)))
    return a_hat, is_identity


# ----------------------------------------------------------------------------- kernels ----
def _sigmoid(z):
    # exp on the EUP port, approx reciprocal also on EUP -> no VALU divide.
    return pl.reciprocal(1.0 + jnp.exp(-z), approx=True)


def _identity_fused_kernel(x_ref, w1_ref, b1_ref, w2_ref, b2_ref, o_ref):
    """A_hat == I fast path: both layers fused per node-row tile, no adjacency matmul.

    relu(sigmoid(x)) == sigmoid(x), so the layer-1 relu is dropped.
    """
    z1 = jnp.dot(x_ref[...], w1_ref[...],
                 preferred_element_type=jnp.float32) + b1_ref[...]
    h = _sigmoid(z1)
    z2 = jnp.dot(h.astype(w2_ref.dtype), w2_ref[...],
                 preferred_element_type=jnp.float32) + b2_ref[...]
    o_ref[...] = _sigmoid(z2).astype(o_ref.dtype)


def _general_fused_kernel(adj_ref, x_ref, w1_ref, b1_ref, w2_ref, b2_ref, o_ref):
    """General A_hat, whole padded graph VMEM-resident (single launch, no HBM h)."""
    adj = adj_ref[...]
    # layer 1: h = relu(sigmoid((A @ X) @ W1 + b1)) == sigmoid(...)
    ax = jnp.dot(adj, x_ref[...], preferred_element_type=jnp.float32)
    z1 = jnp.dot(ax.astype(w1_ref.dtype), w1_ref[...],
                 preferred_element_type=jnp.float32) + b1_ref[...]
    h = _sigmoid(z1)
    # layer 2: logits = sigmoid((A @ h) @ W2 + b2)
    ah = jnp.dot(adj, h.astype(adj.dtype), preferred_element_type=jnp.float32)
    z2 = jnp.dot(ah.astype(w2_ref.dtype), w2_ref[...],
                 preferred_element_type=jnp.float32) + b2_ref[...]
    o_ref[...] = _sigmoid(z2).astype(o_ref.dtype)


def _general_layer_kernel(adj_ref, x_ref, w_ref, b_ref, o_ref):
    """One node-row tile of: sigmoid((A_hat @ X) @ W + b)  (general A_hat, tiled graphs)."""
    ax = jnp.dot(adj_ref[...], x_ref[...], preferred_element_type=jnp.float32)
    z = jnp.dot(ax.astype(w_ref.dtype), w_ref[...],
                preferred_element_type=jnp.float32) + b_ref[...]
    o_ref[...] = _sigmoid(z).astype(o_ref.dtype)


# ----------------------------------------------------------------------------- wrappers ---
def _identity_fused_call(x_p, w1_p, b1_p, w2_p, b2_p, *, tile_n, vmem_limit):
    n_pad, fin_p = x_p.shape
    fhid_p = w1_p.shape[1]
    fout_p = w2_p.shape[1]
    grid = (n_pad // tile_n,)

    bytes_in = sum(int(a.size) * a.dtype.itemsize for a in (x_p, w1_p, b1_p, w2_p, b2_p))
    cost = pl.CostEstimate(
        flops=int(2 * n_pad * fin_p * fhid_p + 2 * n_pad * fhid_p * fout_p),
        transcendentals=int(2 * n_pad * (fhid_p + fout_p)),   # exp + rcp per element
        bytes_accessed=int(bytes_in + n_pad * fout_p * 4),
    )

    return pl.pallas_call(
        _identity_fused_kernel,
        out_shape=jax.ShapeDtypeStruct((n_pad, fout_p), jnp.float32),
        grid=grid,
        in_specs=[
            pl.BlockSpec((tile_n, fin_p), lambda i: (i, 0)),    # feature row tile (pipelined)
            pl.BlockSpec((fin_p, fhid_p), lambda i: (0, 0)),    # W1 (VMEM-resident)
            pl.BlockSpec((1, fhid_p), lambda i: (0, 0)),        # b1
            pl.BlockSpec((fhid_p, fout_p), lambda i: (0, 0)),   # W2 (VMEM-resident)
            pl.BlockSpec((1, fout_p), lambda i: (0, 0)),        # b2
        ],
        out_specs=pl.BlockSpec((tile_n, fout_p), lambda i: (i, 0)),
        compiler_params=pltpu.CompilerParams(
            dimension_semantics=("parallel",),
            vmem_limit_bytes=vmem_limit,
        ),
        cost_estimate=cost,
    )(x_p, w1_p, b1_p, w2_p, b2_p)


def _general_fused_call(adj_p, x_p, w1_p, b1_p, w2_p, b2_p, *, vmem_limit):
    n_pad = adj_p.shape[0]
    fin_p, fhid_p = w1_p.shape
    fout_p = w2_p.shape[1]

    def full(shape):
        return pl.BlockSpec(shape, lambda: (0,) * len(shape))

    flops = 2 * n_pad * (n_pad * fin_p + fin_p * fhid_p + n_pad * fhid_p + fhid_p * fout_p)
    bytes_in = sum(int(a.size) * a.dtype.itemsize
                   for a in (adj_p, x_p, w1_p, b1_p, w2_p, b2_p))
    cost = pl.CostEstimate(
        flops=int(flops),
        transcendentals=int(2 * n_pad * (fhid_p + fout_p)),
        bytes_accessed=int(bytes_in + n_pad * fout_p * 4),
    )

    return pl.pallas_call(
        _general_fused_kernel,
        out_shape=jax.ShapeDtypeStruct((n_pad, fout_p), jnp.float32),
        in_specs=[full((n_pad, n_pad)), full((n_pad, fin_p)),
                  full((fin_p, fhid_p)), full((1, fhid_p)),
                  full((fhid_p, fout_p)), full((1, fout_p))],
        out_specs=full((n_pad, fout_p)),
        compiler_params=pltpu.CompilerParams(vmem_limit_bytes=vmem_limit),
        cost_estimate=cost,
    )(adj_p, x_p, w1_p, b1_p, w2_p, b2_p)


def _general_layer_call(adj_p, x_p, w_p, b_p, *, out_dtype, tile_n, vmem_limit):
    """Node-tiled single GCN layer (general A_hat): grid over row tiles of A_hat."""
    n_pad = adj_p.shape[0]
    fin_p = x_p.shape[1]
    fout_p = w_p.shape[1]
    grid = (n_pad // tile_n,)

    bytes_in = sum(int(a.size) * a.dtype.itemsize for a in (adj_p, x_p, w_p, b_p))
    cost = pl.CostEstimate(
        flops=int(2 * n_pad * n_pad * fin_p + 2 * n_pad * fin_p * fout_p),
        transcendentals=int(2 * n_pad * fout_p),
        bytes_accessed=int(bytes_in + n_pad * fout_p * np.dtype(out_dtype).itemsize),
    )

    return pl.pallas_call(
        _general_layer_kernel,
        out_shape=jax.ShapeDtypeStruct((n_pad, fout_p), out_dtype),
        grid=grid,
        in_specs=[
            pl.BlockSpec((tile_n, n_pad), lambda i: (i, 0)),   # adjacency row tile (pipelined)
            pl.BlockSpec((n_pad, fin_p), lambda i: (0, 0)),    # full features (VMEM-resident)
            pl.BlockSpec((fin_p, fout_p), lambda i: (0, 0)),   # weight (VMEM-resident)
            pl.BlockSpec((1, fout_p), lambda i: (0, 0)),       # bias row
        ],
        out_specs=pl.BlockSpec((tile_n, fout_p), lambda i: (i, 0)),
        compiler_params=pltpu.CompilerParams(
            dimension_semantics=("parallel",),
            vmem_limit_bytes=vmem_limit,
        ),
        cost_estimate=cost,
    )(adj_p, x_p, w_p, b_p)


# ----------------------------------------------------------------------------- the net ----
class TMAGcnNet:
    """Two-layer TMA GCN.  All per-call-invariant work (adjacency construction from the
    motif tensors, weight/bias padding, tile/VMEM-budget selection) happens ONCE here."""

    def __init__(self, w1, b1, w2, b2, n_nodes, *,
                 compute_dtype=jnp.bfloat16, force_general=False):
        self.n = int(n_nodes)
        self.fin = int(w1.shape[0])
        self.fhid = int(w1.shape[1])
        self.fout = int(w2.shape[1])
        self.cd = compute_dtype

        # --- adjacency: rebuilt from motif tensors exactly like the module, once ----------
        self.a_hat, is_identity = build_module_adjacency(self.n)
        self.use_identity_fast_path = is_identity and not force_general

        # --- tile / padding geometry ------------------------------------------------------
        max_tile = 128 if _is_v5() else 256           # v5e MXU 4x128^2; v6e/v7x 2x256^2
        n_pad = _round_up(self.n, _LANE)
        if n_pad <= max_tile:
            tile_n = n_pad                            # whole (padded) graph in one row tile
        else:
            tile_n = max_tile
            n_pad = _round_up(self.n, tile_n)
        self.n_pad, self.tile_n = n_pad, tile_n
        self.fin_p = _round_up(self.fin, _LANE)
        self.fhid_p = _round_up(self.fhid, _LANE)
        self.fout_p = _round_up(self.fout, _LANE)
        self.vmem_limit = _vmem_limit_bytes()

        # --- padded, cast parameters (hoisted out of forward) ------------------------------
        # NOTE: padded hidden columns of h become sigmoid(0)=0.5; this is harmless only
        # because W2's padded rows are zero.  Keep that invariant if refactoring.
        cd = self.cd
        self.w1_p = _pad2(w1, (self.fin_p, self.fhid_p), cd)
        self.w2_p = _pad2(w2, (self.fhid_p, self.fout_p), cd)
        self.b1_p = _pad2(jnp.asarray(b1)[None, :], (1, self.fhid_p), jnp.float32)
        self.b2_p = _pad2(jnp.asarray(b2)[None, :], (1, self.fout_p), jnp.float32)
        self.adj_p = _pad2(self.a_hat, (self.n_pad, self.n_pad), cd)

        self._forward = jax.jit(self._forward_impl)

    def _forward_impl(self, feature):
        x_p = _pad2(feature, (self.n_pad, self.fin_p), self.cd)
        if self.use_identity_fast_path:
            # A_hat == I -> skip the O(N^2) adjacency matmuls entirely; both layers fused.
            y_p = _identity_fused_call(x_p, self.w1_p, self.b1_p, self.w2_p, self.b2_p,
                                       tile_n=self.tile_n, vmem_limit=self.vmem_limit)
        elif self.n_pad == self.tile_n:
            y_p = _general_fused_call(self.adj_p, x_p, self.w1_p, self.b1_p,
                                      self.w2_p, self.b2_p, vmem_limit=self.vmem_limit)
        else:
            # layer-1 output stored in compute dtype so layer 2 feeds the MXU directly
            h_p = _general_layer_call(self.adj_p, x_p, self.w1_p, self.b1_p,
                                      out_dtype=self.cd, tile_n=self.tile_n,
                                      vmem_limit=self.vmem_limit)
            y_p = _general_layer_call(self.adj_p, h_p, self.w2_p, self.b2_p,
                                      out_dtype=jnp.float32, tile_n=self.tile_n,
                                      vmem_limit=self.vmem_limit)
        return y_p[: self.n, : self.fout]

    def __call__(self, adjacency, feature):
        # `adjacency` is accepted but ignored, exactly like the module (which rebuilds
        # A_hat from its motif tensors).
        del adjacency
        return self._forward(feature)


# ----------------------------------------------------------------------------- reference --
def gcn_net_reference(feature, a_hat, w1, b1, w2, b2, compute_dtype):
    """Pure-JAX reference mirroring the kernel's dtype handling."""
    cd = compute_dtype
    hp = lax.Precision.HIGHEST

    def layer(x, w, b):
        ax = jnp.dot(a_hat.astype(cd), x.astype(cd),
                     preferred_element_type=jnp.float32, precision=hp)
        z = jnp.dot(ax.astype(cd), w.astype(cd),
                    preferred_element_type=jnp.float32, precision=hp)
        z = z + b[None, :]
        return jax.nn.sigmoid(z)

    h = jnp.maximum(layer(feature, w1, b1), 0.0).astype(cd).astype(jnp.float32)
    return layer(h, w2, b2)


def init_params(key, input_dim, hid_dim, output_dim):
    """kaiming-uniform weights stored [in, out] (like TMA_GraphConvolution.weight), zero biases."""
    k1, k2 = jax.random.split(key)

    def kaiming_uniform(k, shape):
        bound = math.sqrt(6.0 / shape[1])   # weight is [in, out] -> torch uses dim 1 as fan_in
        return jax.random.uniform(k, shape, jnp.float32, -bound, bound)

    w1 = kaiming_uniform(k1, (input_dim, hid_dim))
    b1 = jnp.zeros((hid_dim,), jnp.float32)
    w2 = kaiming_uniform(k2, (hid_dim, output_dim))
    b2 = jnp.zeros((output_dim,), jnp.float32)
    return w1, b1, w2, b2


# ----------------------------------------------------------------------------- main -------
if __name__ == "__main__":
    # Shapes consistent with the module: 84 nodes (tor_M is (36, 84, 84)),
    # input_dim=16, hid_dim=32, output_dim=8.
    n_nodes, input_dim, hid_dim, output_dim = 84, 16, 32, 8

    key = jax.random.PRNGKey(0)
    k_feat, k_adj, k_par = jax.random.split(key, 3)
    feature = jax.random.normal(k_feat, (n_nodes, input_dim), dtype=jnp.float32)
    # Passed only to mirror the forward() signature; the module ignores it.
    adjacency = (jax.random.uniform(k_adj, (n_nodes, n_nodes)) > 0.9).astype(jnp.float32)
    w1, b1, w2, b2 = init_params(k_par, input_dim, hid_dim, output_dim)

    # 1) default fast path: A_hat is the identity -> adjacency matmuls skipped, both layers
    #    fused in a single pallas_call.
    net = TMAGcnNet(w1, b1, w2, b2, n_nodes)
    ref = gcn_net_reference(feature, net.a_hat, w1, b1, w2, b2, jnp.bfloat16)

    logits = net(adjacency, feature)
    jax.block_until_ready(logits)
    assert logits.shape == (n_nodes, output_dim), logits.shape
    assert bool(jnp.all(jnp.isfinite(logits)))
    assert jnp.allclose(logits, ref, atol=2e-2, rtol=2e-2), \
        f"identity-path mismatch: {float(jnp.max(jnp.abs(logits - ref)))}"

    # 2) general-adjacency path (A_hat matmuls on the MXU), exercised for coverage.
    net_general = TMAGcnNet(w1, b1, w2, b2, n_nodes, force_general=True)
    logits_g = net_general(adjacency, feature)
    jax.block_until_ready(logits_g)
    assert jnp.allclose(logits_g, ref, atol=2e-2, rtol=2e-2), \
        f"general-path mismatch: {float(jnp.max(jnp.abs(logits_g - ref)))}"

    print("KERNEL_OK")
</pallas_src>

<mosaic_0001>
module attributes {stable_mosaic.version = 11 : i64} {
  func.func @_identity_fused_kernel(%arg0: i32, %arg1: memref<128x128xbf16, #tpu.memory_space<vmem>>, %arg2: memref<128x128xbf16, #tpu.memory_space<vmem>>, %arg3: memref<1x128xf32, #tpu.memory_space<vmem>>, %arg4: memref<128x128xbf16, #tpu.memory_space<vmem>>, %arg5: memref<1x128xf32, #tpu.memory_space<vmem>>, %arg6: memref<128x128xf32, #tpu.memory_space<vmem>>) attributes {dimension_semantics = [#tpu.dimension_semantics<parallel>], iteration_bounds = array<i64: 1>, scalar_prefetch = 0 : i64, scratch_operands = 0 : i64, tpu.core_type = #tpu.core_type<tc>, window_params = [{transform_indices = @transform_0, window_bounds = array<i64: 128, 128>}, {pipeline_mode = #tpu.pipeline_mode<synchronous>, transform_indices = @transform_1, window_bounds = array<i64: 128, 128>}, {pipeline_mode = #tpu.pipeline_mode<synchronous>, transform_indices = @transform_2, window_bounds = array<i64: 1, 128>}, {pipeline_mode = #tpu.pipeline_mode<synchronous>, transform_indices = @transform_3, window_bounds = array<i64: 128, 128>}, {pipeline_mode = #tpu.pipeline_mode<synchronous>, transform_indices = @transform_4, window_bounds = array<i64: 1, 128>}, {transform_indices = @transform_5, window_bounds = array<i64: 128, 128>}]} {
    %c0 = arith.constant 0 : index
    %c0_0 = arith.constant 0 : index
    %0 = vector.load %arg1[%c0, %c0_0] : memref<128x128xbf16, #tpu.memory_space<vmem>>, vector<128x128xbf16>
    %c0_1 = arith.constant 0 : index
    %c0_2 = arith.constant 0 : index
    %1 = vector.load %arg2[%c0_1, %c0_2] : memref<128x128xbf16, #tpu.memory_space<vmem>>, vector<128x128xbf16>
    %cst = arith.constant dense<0.000000e+00> : vector<128x128xf32>
    %2 = tpu.matmul %0, %1, %cst {dimension_numbers = #tpu.dot_dimension_numbers<[1], [0], [0], [1], [0, 0, 1, 1], [], []>} : vector<128x128xbf16>, vector<128x128xbf16>, vector<128x128xf32> -> vector<128x128xf32>
    %c0_3 = arith.constant 0 : index
    %c0_4 = arith.constant 0 : index
    %3 = vector.load %arg3[%c0_3, %c0_4] : memref<1x128xf32, #tpu.memory_space<vmem>>, vector<1x128xf32>
    %4 = vector.broadcast %3 : vector<1x128xf32> to vector<128x128xf32>
    %5 = arith.addf %2, %4 : vector<128x128xf32>
    %cst_5 = arith.constant 0.000000e+00 : f32
    %6 = vector.broadcast %cst_5 : f32 to vector<128x128xf32>
    %7 = arith.subf %6, %5 : vector<128x128xf32>
    %8 = math.exp %7 : vector<128x128xf32>
    %cst_6 = arith.constant 1.000000e+00 : f32
    %9 = vector.broadcast %cst_6 : f32 to vector<128x128xf32>
    %10 = arith.addf %9, %8 : vector<128x128xf32>
    %11 = tpu.reciprocal %10 {approx = true} : vector<128x128xf32> -> vector<128x128xf32>
    %12 = arith.truncf %11 : vector<128x128xf32> to vector<128x128xbf16>
    %c0_7 = arith.constant 0 : index
    %c0_8 = arith.constant 0 : index
    %13 = vector.load %arg4[%c0_7, %c0_8] : memref<128x128xbf16, #tpu.memory_space<vmem>>, vector<128x128xbf16>
    %cst_9 = arith.constant dense<0.000000e+00> : vector<128x128xf32>
    %14 = tpu.matmul %12, %13, %cst_9 {dimension_numbers = #tpu.dot_dimension_numbers<[1], [0], [0], [1], [0, 0, 1, 1], [], []>} : vector<128x128xbf16>, vector<128x128xbf16>, vector<128x128xf32> -> vector<128x128xf32>
    %c0_10 = arith.constant 0 : index
    %c0_11 = arith.constant 0 : index
    %15 = vector.load %arg5[%c0_10, %c0_11] : memref<1x128xf32, #tpu.memory_space<vmem>>, vector<1x128xf32>
    %16 = vector.broadcast %15 : vector<1x128xf32> to vector<128x128xf32>
    %17 = arith.addf %14, %16 : vector<128x128xf32>
    %cst_12 = arith.constant 0.000000e+00 : f32
    %18 = vector.broadcast %cst_12 : f32 to vector<128x128xf32>
    %19 = arith.subf %18, %17 : vector<128x128xf32>
    %20 = math.exp %19 : vector<128x128xf32>
    %cst_13 = arith.constant 1.000000e+00 : f32
    %21 = vector.broadcast %cst_13 : f32 to vector<128x128xf32>
    %22 = arith.addf %21, %20 : vector<128x128xf32>
    %23 = tpu.reciprocal %22 {approx = true} : vector<128x128xf32> -> vector<128x128xf32>
    %c0_14 = arith.constant 0 : index
    %c0_15 = arith.constant 0 : index
    %24 = vector.load %arg6[%c0_14, %c0_15] : memref<128x128xf32, #tpu.memory_space<vmem>>, vector<128x128xf32>
    tpu.vector_store %arg6[%c0_14, %c0_15], %23 {strides = array<i32>} : memref<128x128xf32, #tpu.memory_space<vmem>>, vector<128x128xf32>,
    return
  }
  func.func @transform_0(%arg0: i32) -> (i32, i32) {
    %c0_i32 = arith.constant 0 : i32
    %c0_i32_0 = arith.constant 0 : i32
    return %arg0, %c0_i32 : i32, i32
  }
  func.func @transform_1(%arg0: i32) -> (i32, i32) {
    %c0_i32 = arith.constant 0 : i32
    %c0_i32_0 = arith.constant 0 : i32
    %c0_i32_1 = arith.constant 0 : i32
    return %c0_i32, %c0_i32_0 : i32, i32
  }
  func.func @transform_2(%arg0: i32) -> (i32, i32) {
    %c0_i32 = arith.constant 0 : i32
    %c0_i32_0 = arith.constant 0 : i32
    %c0_i32_1 = arith.constant 0 : i32
    return %c0_i32, %c0_i32_0 : i32, i32
  }
  func.func @transform_3(%arg0: i32) -> (i32, i32) {
    %c0_i32 = arith.constant 0 : i32
    %c0_i32_0 = arith.constant 0 : i32
    %c0_i32_1 = arith.constant 0 : i32
    return %c0_i32, %c0_i32_0 : i32, i32
  }
  func.func @transform_4(%arg0: i32) -> (i32, i32) {
    %c0_i32 = arith.constant 0 : i32
    %c0_i32_0 = arith.constant 0 : i32
    %c0_i32_1 = arith.constant 0 : i32
    return %c0_i32, %c0_i32_0 : i32, i32
  }
  func.func @transform_5(%arg0: i32) -> (i32, i32) {
    %c0_i32 = arith.constant 0 : i32
    %c0_i32_0 = arith.constant 0 : i32
    return %arg0, %c0_i32 : i32, i32
  }
}

</mosaic_0001>

<bundles_post_ra>
// kernel: _forward_impl.1
= control target key start
LH: loop header
LB: loop body
LE: loop exit
PB: predicated region body
PF: predicated region fallthrough
CT: control target
= control target key end

     0   :  { %s964_s1 = inlined_call_operand.vmem [shape: bf16[128,128], index: 1, kind: input, shape index: {}]   ;;  %s965_s2 = inlined_call_operand.vmem [shape: f32[1,128], index: 2, kind: input, shape index: {}, may-alias: {2,4}]   ;;  %s966_s0 = inlined_call_operand.vmem [shape: bf16[128,128], index: 0, kind: input, shape index: {}]   ;;  %s967_s4 = inlined_call_operand.vmem [shape: f32[1,128], index: 4, kind: input, shape index: {}, may-alias: {2,4}]   ;;  %s968_s3 = inlined_call_operand.vmem [shape: bf16[128,128], index: 3, kind: input, shape index: {}]   ;;  %s969_s5 = inlined_call_operand.vmem [shape: f32[128,128], index: 5, kind: output, shape index: {}]  }
   0x1   :  { %v617_v0 = vld [vmem:[%s964_s1 + $0x38] sm:$0xff]  ;;  %v616_v1 = vld [vmem:[%s964_s1 + $0x30] sm:$0xff]  ;;  %v615_v2 = vld [vmem:[%s964_s1 + $0x28] sm:$0xff] }
   0x2   :  { %152 = vmatpush.bf16.msra.mxu0 %v617_v0  ;;  %626 = vmatpush.bf16.msra.mxu2 %v617_v0  ;;  %v614_v3 = vld [vmem:[%s964_s1 + $0x20] sm:$0xff]  ;;  %v613_v4 = vld [vmem:[%s964_s1 + $0x18] sm:$0xff]  ;;  %v612_v5 = vld [vmem:[%s964_s1 + $0x10] sm:$0xff] }
   0x3   :  { %v611_v6 = vld [vmem:[%s964_s1 + $0x8] sm:$0xff]  ;;  %v610_v7 = vld [vmem:[%s964_s1] sm:$0xff]  ;;  %v604_v12 = vld [vmem:[%s966_s0 + $0x10] sm:$0xff] }
   0x4   :  { %v602_v8 = vld [vmem:[%s966_s0] sm:$0xff]  ;;  %v603_v10 = vld [vmem:[%s966_s0 + $0x8] sm:$0xff]  ;;  %v608_v13 = vld [vmem:[%s966_s0 + $0x30] sm:$0xff] }
   0x5   :  { %v606_v9 = vld [vmem:[%s966_s0 + $0x20] sm:$0xff]  ;;  %v607_v11 = vld [vmem:[%s966_s0 + $0x28] sm:$0xff]  ;;  %v605_v14 = vld [vmem:[%s966_s0 + $0x18] sm:$0xff] }
   0x6   :  { %153 = vmatpush.bf16.msra.mxu0 %v616_v1  ;;  %627 = vmatpush.bf16.msra.mxu2 %v616_v1  ;;  %v609_v15 = vld [vmem:[%s966_s0 + $0x38] sm:$0xff]  ;;  %v624_v17 = vld [vmem:[%s968_s3 + $0x30] sm:$0xff]  ;;  %v623_v18 = vld [vmem:[%s968_s3 + $0x28] sm:$0xff] }
   0x7   :  { %v625_v16 = vld [vmem:[%s968_s3 + $0x38] sm:$0xff]  ;;  %v622_v19 = vld [vmem:[%s968_s3 + $0x20] sm:$0xff]  ;;  %v620_v21 = vld [vmem:[%s968_s3 + $0x10] sm:$0xff] }
   0x8   :  { %357 = vmatpush.bf16.msra.mxu1 %v625_v16  ;;  %634 = vmatpush.bf16.msra.mxu3 %v625_v16  ;;  %v621_v20 = vld [vmem:[%s968_s3 + $0x18] sm:$0xff]  ;;  %v619_v22 = vld [vmem:[%s968_s3 + $0x8] sm:$0xff]  ;;  %v618_v23 = vld [vmem:[%s968_s3] sm:$0xff] }
   0x9   :  { %v877_v24 = vld [vmem:[%s965_s2] ss:$0 sm:$0xff] }
   0xa   :  { %154 = vmatpush.bf16.msra.mxu0 %v615_v2  ;;  %628 = vmatpush.bf16.msra.mxu2 %v615_v2 }
   0xc   :  { %358 = vmatpush.bf16.msra.mxu1 %v624_v17  ;;  %635 = vmatpush.bf16.msra.mxu3 %v624_v17 }
   0xe   :  { %155 = vmatpush.bf16.msra.mxu0 %v614_v3  ;;  %629 = vmatpush.bf16.msra.mxu2 %v614_v3 }
  0x10   :  { %359 = vmatpush.bf16.msra.mxu1 %v623_v18  ;;  %636 = vmatpush.bf16.msra.mxu3 %v623_v18 }
  0x12   :  { %156 = vmatpush.bf16.msra.mxu0 %v613_v4  ;;  %630 = vmatpush.bf16.msra.mxu2 %v613_v4 }
  0x14   :  { %360 = vmatpush.bf16.msra.mxu1 %v622_v19  ;;  %637 = vmatpush.bf16.msra.mxu3 %v622_v19 }
  0x16   :  { %157 = vmatpush.bf16.msra.mxu0 %v612_v5  ;;  %631 = vmatpush.bf16.msra.mxu2 %v612_v5 }
  0x18   :  { %361 = vmatpush.bf16.msra.mxu1 %v621_v20  ;;  %638 = vmatpush.bf16.msra.mxu3 %v621_v20 }
  0x1a   :  { %158 = vmatpush.bf16.msra.mxu0 %v611_v6  ;;  %632 = vmatpush.bf16.msra.mxu2 %v611_v6 }
  0x1c   :  { %362 = vmatpush.bf16.msra.mxu1 %v620_v21  ;;  %639 = vmatpush.bf16.msra.mxu3 %v620_v21 }
  0x1e   :  { %159 = vmatpush.bf16.msra.mxu0 %v610_v7  ;;  %633 = vmatpush.bf16.msra.mxu2 %v610_v7 }
  0x20   :  { %363 = vmatpush.bf16.msra.mxu1 %v619_v22  ;;  %640 = vmatpush.bf16.msra.mxu3 %v619_v22 }
  0x21   :  { %160 = vmatmul.bf16.vlgmr.msra.gmra.mxu0 %v602_v8  ;;  %180 = vmatmul.bf16.vlgmr.msra.gmra.mxu2 %v606_v9 }
  0x24   :  { %364 = vmatpush.bf16.msra.mxu1 %v618_v23  ;;  %641 = vmatpush.bf16.msra.mxu3 %v618_v23 }
  0x31   :  { %165 = vmatmul.bf16.gmra.mxu0 %v603_v10  ;;  %185 = vmatmul.bf16.gmra.mxu2 %v607_v11 }
  0x41   :  { %170 = vmatmul.bf16.gmra.mxu0 %v604_v12  ;;  %190 = vmatmul.bf16.gmra.mxu2 %v608_v13 }
  0x51   :  { %175 = vmatmul.bf16.gmra.mxu0 %v605_v14  ;;  %195 = vmatmul.bf16.gmra.mxu2 %v609_v15 }
  0x9e   :  { %v161_v25 = vpop.f32.mrf.mxu0 }
  0x9f   :  { %v162_v26 = vadd.f32 %v877_v24, %v161_v25 }
  0xa1   :  { %v201_v27 = vsub.f32 0.0, %v162_v26 }
  0xa3   :  { %v217_v28 = vmul.f32 1.442695, %v201_v27 }
  0xa4   :  { %v181_v29 = vpop.f32.mrf.mxu2 }
  0xa5   :  { %v182_v30 = vadd.f32 %v877_v24, %v181_v29  ;;  %644 = vpow2.f32 %v217_v28 }
  0xa6   :  { %v163_v31 = vpop.f32.mrf.mxu0 }
  0xa7   :  { %v209_v32 = vsub.f32 0.0, %v182_v30  ;;  %v164_v33 = vadd.f32 %v877_v24, %v163_v31 }
  0xa9   :  { %v202_v34 = vsub.f32 0.0, %v164_v33  ;;  %v233_v35 = vmul.f32 1.442695, %v209_v32 }
  0xab   :  { %v219_v36 = vmul.f32 1.442695, %v202_v34  ;;  %v645_v38 = vpop.eup %644 }
  0xac   :  { %v183_v37 = vpop.f32.mrf.mxu2  ;;  %v249_v43 = vadd.f32 1.0, %v645_v38 }
  0xad   :  { %646 = vpow2.f32 %v219_v36  ;;  %v184_v39 = vadd.f32 %v877_v24, %v183_v37 }
  0xae   :  { %648 = vpow2.f32 %v233_v35  ;;  %v166_v40 = vpop.f32.mrf.mxu0 }
  0xaf   :  { %v210_v41 = vsub.f32 0.0, %v184_v39  ;;  %v167_v42 = vadd.f32 %v877_v24, %v166_v40 }
  0xb1   :  { %v235_v44 = vmul.f32 1.442695, %v210_v41  ;;  %v203_v45 = vsub.f32 0.0, %v167_v42 }
  0xb3   :  { %v647_v46 = vpop.eup %646  ;;  %650 = vpow2.f32 %v235_v44  ;;  %v221_v47 = vmul.f32 1.442695, %v203_v45 }
  0xb4   :  { %v649_v48 = vpop.eup %648  ;;  %652 = vrcp.f32 %v249_v43  ;;  %v250_v49 = vadd.f32 1.0, %v647_v46  ;;  %v186_v50 = vpop.f32.mrf.mxu2 }
  0xb5   :  { %v187_v51 = vadd.f32 %v877_v24, %v186_v50  ;;  %v257_v53 = vadd.f32 1.0, %v649_v48 }
  0xb6   :  { %654 = vrcp.f32 %v250_v49  ;;  %v168_v52 = vpop.f32.mrf.mxu0 }
  0xb7   :  { %656 = vpow2.f32 %v221_v47  ;;  %v211_v54 = vsub.f32 0.0, %v187_v51  ;;  %v169_v55 = vadd.f32 %v877_v24, %v168_v52 }
  0xb8   :  { %658 = vrcp.f32 %v257_v53 }
  0xb9   :  { %v651_v56 = vpop.eup %650  ;;  %v204_v57 = vsub.f32 0.0, %v169_v55  ;;  %v237_v60 = vmul.f32 1.442695, %v211_v54 }
  0xba   :  { %v653_v58 = vpop.eup %652  ;;  %v258_v59 = vadd.f32 1.0, %v651_v56 }
  0xbb   :  { %v223_v61 = vmul.f32 1.442695, %v204_v57 }
  0xbc   :  { %v655_v62 = vpop.eup %654  ;;  %660 = vrcp.f32 %v258_v59  ;;  %v188_v63 = vpop.f32.mrf.mxu2 }
  0xbd   :  { %v657_v0 = vpop.eup %656  ;;  %662 = vpow2.f32 %v223_v61  ;;  %v189_v1 = vadd.f32 %v877_v24, %v188_v63  ;;  %v281_v2 = vpack.c.bf16 %v655_v62, %v653_v58 }
  0xbe   :  { %664 = vpow2.f32 %v237_v60  ;;  %v171_v3 = vpop.f32.mrf.mxu0  ;;  %v251_v6 = vadd.f32 1.0, %v657_v0  ;;  %v659_v7 = vpop.eup %658 }
  0xbf   :  { %v212_v4 = vsub.f32 0.0, %v189_v1  ;;  %v172_v5 = vadd.f32 %v877_v24, %v171_v3  ;;  %365 = vmatmul.bf16.vlgmr.msra.gmra.mxu1 %v281_v2 }
  0xc1   :  { %v239_v8 = vmul.f32 1.442695, %v212_v4  ;;  %v205_v9 = vsub.f32 0.0, %v172_v5 }
  0xc2   :  { %v661_v10 = vpop.eup %660 }
  0xc3   :  { %v663_v11 = vpop.eup %662  ;;  %666 = vpow2.f32 %v239_v8  ;;  %v225_v12 = vmul.f32 1.442695, %v205_v9  ;;  %v285_v13 = vpack.c.bf16 %v661_v10, %v659_v7 }
  0xc4   :  { %v665_v14 = vpop.eup %664  ;;  %668 = vrcp.f32 %v251_v6  ;;  %v252_v15 = vadd.f32 1.0, %v663_v11  ;;  %v191_v16 = vpop.f32.mrf.mxu2 }
  0xc5   :  { %v192_v17 = vadd.f32 %v877_v24, %v191_v16  ;;  %385 = vmatmul.bf16.vlgmr.msra.gmra.mxu3 %v285_v13  ;;  %v259_v19 = vadd.f32 1.0, %v665_v14 }
  0xc6   :  { %670 = vrcp.f32 %v252_v15  ;;  %v173_v18 = vpop.f32.mrf.mxu0 }
  0xc7   :  { %672 = vpow2.f32 %v225_v12  ;;  %v213_v20 = vsub.f32 0.0, %v192_v17  ;;  %v174_v21 = vadd.f32 %v877_v24, %v173_v18  ;;  %v898_v17 = vld [vmem:[%s967_s4] ss:$0 sm:$0xff] }
  0xc8   :  { %674 = vrcp.f32 %v259_v19 }
  0xc9   :  { %v667_v22 = vpop.eup %666  ;;  %v206_v23 = vsub.f32 0.0, %v174_v21  ;;  %v241_v27 = vmul.f32 1.442695, %v213_v20 }
  0xca   :  { %v669_v25 = vpop.eup %668  ;;  %v260_v26 = vadd.f32 1.0, %v667_v22 }
  0xcb   :  { %v227_v28 = vmul.f32 1.442695, %v206_v23 }
  0xcc   :  { %v671_v29 = vpop.eup %670  ;;  %676 = vrcp.f32 %v260_v26  ;;  %v193_v30 = vpop.f32.mrf.mxu2 }
  0xcd   :  { %v673_v31 = vpop.eup %672  ;;  %678 = vpow2.f32 %v227_v28  ;;  %v194_v32 = vadd.f32 %v877_v24, %v193_v30  ;;  %v282_v33 = vpack.c.bf16 %v671_v29, %v669_v25 }
  0xce   :  { %680 = vpow2.f32 %v241_v27  ;;  %v176_v34 = vpop.f32.mrf.mxu0  ;;  %v253_v37 = vadd.f32 1.0, %v673_v31  ;;  %v675_v38 = vpop.eup %674 }
  0xcf   :  { %v214_v35 = vsub.f32 0.0, %v194_v32  ;;  %v177_v36 = vadd.f32 %v877_v24, %v176_v34  ;;  %370 = vmatmul.bf16.gmra.mxu1 %v282_v33 }
  0xd1   :  { %v243_v39 = vmul.f32 1.442695, %v214_v35  ;;  %v207_v40 = vsub.f32 0.0, %v177_v36 }
  0xd2   :  { %v677_v41 = vpop.eup %676 }
  0xd3   :  { %v679_v42 = vpop.eup %678  ;;  %682 = vpow2.f32 %v243_v39  ;;  %v229_v43 = vmul.f32 1.442695, %v207_v40  ;;  %v286_v44 = vpack.c.bf16 %v677_v41, %v675_v38 }
  0xd4   :  { %v681_v45 = vpop.eup %680  ;;  %684 = vrcp.f32 %v253_v37  ;;  %v254_v46 = vadd.f32 1.0, %v679_v42  ;;  %v196_v47 = vpop.f32.mrf.mxu2 }
  0xd5   :  { %v197_v48 = vadd.f32 %v877_v24, %v196_v47  ;;  %390 = vmatmul.bf16.gmra.mxu3 %v286_v44  ;;  %v261_v50 = vadd.f32 1.0, %v681_v45 }
  0xd6   :  { %686 = vrcp.f32 %v254_v46  ;;  %v178_v49 = vpop.f32.mrf.mxu0 }
  0xd7   :  { %688 = vpow2.f32 %v229_v43  ;;  %v215_v51 = vsub.f32 0.0, %v197_v48  ;;  %v179_v52 = vadd.f32 %v877_v24, %v178_v49 }
  0xd8   :  { %690 = vrcp.f32 %v261_v50 }
  0xd9   :  { %v683_v53 = vpop.eup %682  ;;  %v208_v54 = vsub.f32 0.0, %v179_v52  ;;  %v245_v57 = vmul.f32 1.442695, %v215_v51 }
  0xda   :  { %v685_v55 = vpop.eup %684  ;;  %v262_v56 = vadd.f32 1.0, %v683_v53 }
  0xdb   :  { %v231_v58 = vmul.f32 1.442695, %v208_v54 }
  0xdc   :  { %v687_v59 = vpop.eup %686  ;;  %692 = vrcp.f32 %v262_v56  ;;  %v198_v60 = vpop.f32.mrf.mxu2 }
  0xdd   :  { %v689_v61 = vpop.eup %688  ;;  %694 = vpow2.f32 %v231_v58  ;;  %v199_v62 = vadd.f32 %v877_v24, %v198_v60  ;;  %v283_v63 = vpack.c.bf16 %v687_v59, %v685_v55 }
  0xde   :  { %696 = vpow2.f32 %v245_v57  ;;  %v255_v1 = vadd.f32 1.0, %v689_v61  ;;  %v691_v2 = vpop.eup %690 }
  0xdf   :  { %v216_v0 = vsub.f32 0.0, %v199_v62  ;;  %375 = vmatmul.bf16.gmra.mxu1 %v283_v63 }
  0xe1   :  { %v247_v3 = vmul.f32 1.442695, %v216_v0 }
  0xe2   :  { %v693_v4 = vpop.eup %692 }
  0xe3   :  { %v695_v5 = vpop.eup %694  ;;  %698 = vpow2.f32 %v247_v3  ;;  %v287_v6 = vpack.c.bf16 %v693_v4, %v691_v2 }
  0xe4   :  { %v697_v7 = vpop.eup %696  ;;  %700 = vrcp.f32 %v255_v1  ;;  %v256_v8 = vadd.f32 1.0, %v695_v5 }
  0xe5   :  { %395 = vmatmul.bf16.gmra.mxu3 %v287_v6  ;;  %v263_v9 = vadd.f32 1.0, %v697_v7 }
  0xe6   :  { %702 = vrcp.f32 %v256_v8 }
  0xe7   :  { %704 = vrcp.f32 %v263_v9 }
  0xe9   :  { %v699_v10 = vpop.eup %698 }
  0xea   :  { %v701_v11 = vpop.eup %700  ;;  %v264_v24 = vadd.f32 1.0, %v699_v10 }
  0xec   :  { %v703_v12 = vpop.eup %702  ;;  %706 = vrcp.f32 %v264_v24 }
  0xed   :  { %v284_v13 = vpack.c.bf16 %v703_v12, %v701_v11  ;;  %v705_v14 = vpop.eup %704 }
  0xef   :  { %380 = vmatmul.bf16.gmra.mxu1 %v284_v13 }
  0xf2   :  { %v707_v15 = vpop.eup %706 }
  0xf3   :  { %v288_v16 = vpack.c.bf16 %v707_v15, %v705_v14 }
  0xf5   :  { %400 = vmatmul.bf16.gmra.mxu3 %v288_v16 }
 0x13c   :  { %v366_v18 = vpop.f32.mrf.mxu1 }
 0x13d   :  { %v367_v19 = vadd.f32 %v898_v17, %v366_v18 }
 0x13f   :  { %v406_v20 = vsub.f32 0.0, %v367_v19 }
 0x141   :  { %v422_v21 = vmul.f32 1.442695, %v406_v20 }
 0x143   :  { %708 = vpow2.f32 %v422_v21 }
 0x144   :  { %v368_v22 = vpop.f32.mrf.mxu1 }
 0x145   :  { %v369_v23 = vadd.f32 %v898_v17, %v368_v22 }
 0x147   :  { %v407_v25 = vsub.f32 0.0, %v369_v23 }
 0x148   :  { %v386_v26 = vpop.f32.mrf.mxu3 }
 0x149   :  { %v709_v27 = vpop.eup %708  ;;  %v424_v28 = vmul.f32 1.442695, %v407_v25  ;;  %v387_v29 = vadd.f32 %v898_v17, %v386_v26 }
 0x14a   :  { %v454_v30 = vadd.f32 1.0, %v709_v27 }
 0x14b   :  { %710 = vpow2.f32 %v424_v28  ;;  %v414_v31 = vsub.f32 0.0, %v387_v29 }
 0x14c   :  { %712 = vrcp.f32 %v454_v30  ;;  %v371_v32 = vpop.f32.mrf.mxu1 }
 0x14d   :  { %v438_v33 = vmul.f32 1.442695, %v414_v31  ;;  %v372_v34 = vadd.f32 %v898_v17, %v371_v32 }
 0x14f   :  { %714 = vpow2.f32 %v438_v33  ;;  %v408_v35 = vsub.f32 0.0, %v372_v34 }
 0x150   :  { %v388_v36 = vpop.f32.mrf.mxu3 }
 0x151   :  { %v711_v37 = vpop.eup %710  ;;  %v426_v38 = vmul.f32 1.442695, %v408_v35  ;;  %v389_v39 = vadd.f32 %v898_v17, %v388_v36 }
 0x152   :  { %v713_v40 = vpop.eup %712  ;;  %v455_v41 = vadd.f32 1.0, %v711_v37 }
 0x153   :  { %486 = vst [vmem:[%s969_s5] sm:$0xff] %v713_v40  ;;  %716 = vpow2.f32 %v426_v38  ;;  %v415_v42 = vsub.f32 0.0, %v389_v39 }
 0x154   :  { %718 = vrcp.f32 %v455_v41  ;;  %v373_v43 = vpop.f32.mrf.mxu1 }
 0x155   :  { %v715_v44 = vpop.eup %714  ;;  %v440_v45 = vmul.f32 1.442695, %v415_v42  ;;  %v374_v46 = vadd.f32 %v898_v17, %v373_v43 }
 0x156   :  { %v462_v47 = vadd.f32 1.0, %v715_v44 }
 0x157   :  { %720 = vpow2.f32 %v440_v45  ;;  %v409_v48 = vsub.f32 0.0, %v374_v46 }
 0x158   :  { %722 = vrcp.f32 %v462_v47  ;;  %v391_v49 = vpop.f32.mrf.mxu3 }
 0x159   :  { %v717_v50 = vpop.eup %716  ;;  %v428_v51 = vmul.f32 1.442695, %v409_v48  ;;  %v392_v52 = vadd.f32 %v898_v17, %v391_v49 }
 0x15a   :  { %v719_v53 = vpop.eup %718  ;;  %v456_v54 = vadd.f32 1.0, %v717_v50 }
 0x15b   :  { %487 = vst [vmem:[%s969_s5 + $0x8] sm:$0xff] %v719_v53  ;;  %724 = vpow2.f32 %v428_v51  ;;  %v416_v55 = vsub.f32 0.0, %v392_v52 }
 0x15c   :  { %726 = vrcp.f32 %v456_v54  ;;  %v376_v56 = vpop.f32.mrf.mxu1 }
 0x15d   :  { %v721_v57 = vpop.eup %720  ;;  %v442_v58 = vmul.f32 1.442695, %v416_v55  ;;  %v377_v59 = vadd.f32 %v898_v17, %v376_v56 }
 0x15e   :  { %v723_v60 = vpop.eup %722  ;;  %v463_v61 = vadd.f32 1.0, %v721_v57 }
 0x15f   :  { %494 = vst [vmem:[%s969_s5 + $0x40] sm:$0xff] %v723_v60  ;;  %728 = vpow2.f32 %v442_v58  ;;  %v410_v62 = vsub.f32 0.0, %v377_v59 }
 0x160   :  { %730 = vrcp.f32 %v463_v61  ;;  %v393_v63 = vpop.f32.mrf.mxu3 }
 0x161   :  { %v725_v0 = vpop.eup %724  ;;  %v430_v1 = vmul.f32 1.442695, %v410_v62  ;;  %v394_v2 = vadd.f32 %v898_v17, %v393_v63 }
 0x162   :  { %v727_v3 = vpop.eup %726  ;;  %v457_v4 = vadd.f32 1.0, %v725_v0 }
 0x163   :  { %488 = vst [vmem:[%s969_s5 + $0x10] sm:$0xff] %v727_v3  ;;  %732 = vpow2.f32 %v430_v1  ;;  %v417_v5 = vsub.f32 0.0, %v394_v2 }
 0x164   :  { %734 = vrcp.f32 %v457_v4  ;;  %v378_v6 = vpop.f32.mrf.mxu1 }
 0x165   :  { %v729_v7 = vpop.eup %728  ;;  %v444_v8 = vmul.f32 1.442695, %v417_v5  ;;  %v379_v9 = vadd.f32 %v898_v17, %v378_v6 }
 0x166   :  { %v731_v10 = vpop.eup %730  ;;  %v464_v11 = vadd.f32 1.0, %v729_v7 }
 0x167   :  { %495 = vst [vmem:[%s969_s5 + $0x48] sm:$0xff] %v731_v10  ;;  %736 = vpow2.f32 %v444_v8  ;;  %v411_v24 = vsub.f32 0.0, %v379_v9 }
 0x168   :  { %738 = vrcp.f32 %v464_v11  ;;  %v396_v12 = vpop.f32.mrf.mxu3 }
 0x169   :  { %v733_v13 = vpop.eup %732  ;;  %v432_v14 = vmul.f32 1.442695, %v411_v24  ;;  %v397_v15 = vadd.f32 %v898_v17, %v396_v12 }
 0x16a   :  { %v735_v16 = vpop.eup %734  ;;  %v458_v18 = vadd.f32 1.0, %v733_v13 }
 0x16b   :  { %489 = vst [vmem:[%s969_s5 + $0x18] sm:$0xff] %v735_v16  ;;  %740 = vpow2.f32 %v432_v14  ;;  %v418_v19 = vsub.f32 0.0, %v397_v15 }
 0x16c   :  { %742 = vrcp.f32 %v458_v18  ;;  %v381_v20 = vpop.f32.mrf.mxu1 }
 0x16d   :  { %v737_v21 = vpop.eup %736  ;;  %v446_v22 = vmul.f32 1.442695, %v418_v19  ;;  %v382_v23 = vadd.f32 %v898_v17, %v381_v20 }
 0x16e   :  { %v739_v25 = vpop.eup %738  ;;  %v465_v26 = vadd.f32 1.0, %v737_v21 }
 0x16f   :  { %496 = vst [vmem:[%s969_s5 + $0x50] sm:$0xff] %v739_v25  ;;  %744 = vpow2.f32 %v446_v22  ;;  %v412_v27 = vsub.f32 0.0, %v382_v23 }
 0x170   :  { %746 = vrcp.f32 %v465_v26  ;;  %v398_v28 = vpop.f32.mrf.mxu3 }
 0x171   :  { %v741_v29 = vpop.eup %740  ;;  %v434_v30 = vmul.f32 1.442695, %v412_v27  ;;  %v399_v31 = vadd.f32 %v898_v17, %v398_v28 }
 0x172   :  { %v743_v32 = vpop.eup %742  ;;  %v459_v33 = vadd.f32 1.0, %v741_v29 }
 0x173   :  { %490 = vst [vmem:[%s969_s5 + $0x20] sm:$0xff] %v743_v32  ;;  %748 = vpow2.f32 %v434_v30  ;;  %v419_v34 = vsub.f32 0.0, %v399_v31 }
 0x174   :  { %750 = vrcp.f32 %v459_v33  ;;  %v383_v35 = vpop.f32.mrf.mxu1 }
 0x175   :  { %v745_v36 = vpop.eup %744  ;;  %v448_v37 = vmul.f32 1.442695, %v419_v34  ;;  %v384_v38 = vadd.f32 %v898_v17, %v383_v35 }
 0x176   :  { %v747_v39 = vpop.eup %746  ;;  %v466_v40 = vadd.f32 1.0, %v745_v36 }
 0x177   :  { %497 = vst [vmem:[%s969_s5 + $0x58] sm:$0xff] %v747_v39  ;;  %752 = vpow2.f32 %v448_v37  ;;  %v413_v41 = vsub.f32 0.0, %v384_v38 }
 0x178   :  { %754 = vrcp.f32 %v466_v40  ;;  %v401_v42 = vpop.f32.mrf.mxu3 }
 0x179   :  { %v749_v43 = vpop.eup %748  ;;  %v436_v44 = vmul.f32 1.442695, %v413_v41  ;;  %v402_v45 = vadd.f32 %v898_v17, %v401_v42 }
 0x17a   :  { %v751_v46 = vpop.eup %750  ;;  %v460_v47 = vadd.f32 1.0, %v749_v43 }
 0x17b   :  { %491 = vst [vmem:[%s969_s5 + $0x28] sm:$0xff] %v751_v46  ;;  %756 = vpow2.f32 %v436_v44  ;;  %v420_v48 = vsub.f32 0.0, %v402_v45 }
 0x17c   :  { %758 = vrcp.f32 %v460_v47 }
 0x17d   :  { %v753_v49 = vpop.eup %752  ;;  %v450_v50 = vmul.f32 1.442695, %v420_v48 }
 0x17e   :  { %v755_v51 = vpop.eup %754  ;;  %v467_v52 = vadd.f32 1.0, %v753_v49 }
 0x17f   :  { %498 = vst [vmem:[%s969_s5 + $0x60] sm:$0xff] %v755_v51  ;;  %760 = vpow2.f32 %v450_v50 }
 0x180   :  { %762 = vrcp.f32 %v467_v52  ;;  %v403_v53 = vpop.f32.mrf.mxu3 }
 0x181   :  { %v757_v54 = vpop.eup %756  ;;  %v404_v55 = vadd.f32 %v898_v17, %v403_v53 }
 0x182   :  { %v759_v56 = vpop.eup %758  ;;  %v461_v57 = vadd.f32 1.0, %v757_v54 }
 0x183   :  { %492 = vst [vmem:[%s969_s5 + $0x30] sm:$0xff] %v759_v56  ;;  %v421_v58 = vsub.f32 0.0, %v404_v55 }
 0x184   :  { %764 = vrcp.f32 %v461_v57 }
 0x185   :  { %v761_v59 = vpop.eup %760  ;;  %v452_v60 = vmul.f32 1.442695, %v421_v58 }
 0x186   :  { %v763_v61 = vpop.eup %762  ;;  %v468_v62 = vadd.f32 1.0, %v761_v59 }
 0x187   :  { %499 = vst [vmem:[%s969_s5 + $0x68] sm:$0xff] %v763_v61  ;;  %766 = vpow2.f32 %v452_v60 }
 0x188   :  { %768 = vrcp.f32 %v468_v62 }
 0x18a   :  { %v765_v63 = vpop.eup %764 }
 0x18b   :  { %493 = vst [vmem:[%s969_s5 + $0x38] sm:$0xff] %v765_v63 }
 0x18d   :  { %v767_v17 = vpop.eup %766 }
 0x18e   :  { %v769_v0 = vpop.eup %768  ;;  %v469_v1 = vadd.f32 1.0, %v767_v17 }
 0x18f   :  { %500 = vst [vmem:[%s969_s5 + $0x70] sm:$0xff] %v769_v0 }
 0x190   :  { %770 = vrcp.f32 %v469_v1 }
 0x196   :  { %v771_v2 = vpop.eup %770 }
 0x197   :  { %501 = vst [vmem:[%s969_s5 + $0x78] sm:$0xff] %v771_v2 }

</bundles_post_ra>
